<compile_context>
chip_gen: v6e
topology: v6e:2x2x1
jax: 0.10.0
libtpu: 0.0.40
codegen_flags: <defaults>
</compile_context>

<pallas_src>
import jax
import jax.numpy as jnp
from jax.experimental import pallas as pl
from jax.experimental.pallas import tpu as pltpu


def _round_up(x, m):
    return (x + m - 1) // m * m


def _degree_days_mlp_kernel(x_ref, w1_ref, b1_ref, w2_ref, b2_ref,
                            w3_ref, b3_ref, o_ref):
    # x_ref: (D, TM) bf16; w*: (out, in) bf16; b*: (out, 1) f32; o_ref: (C, TM) f32
    x = x_ref[...]

    # conv_1 + ReLU
    h1 = jnp.dot(w1_ref[...], x, preferred_element_type=jnp.float32)
    h1 = jnp.maximum(h1 + b1_ref[...], 0.0).astype(jnp.bfloat16)

    # conv_2 + ReLU
    h2 = jnp.dot(w2_ref[...], h1, preferred_element_type=jnp.float32)
    h2 = jnp.maximum(h2 + b2_ref[...], 0.0).astype(jnp.bfloat16)

    # conv_3 + sigmoid
    z = jnp.dot(w3_ref[...], h2, preferred_element_type=jnp.float32)
    o_ref[...] = jax.nn.sigmoid(z + b3_ref[...])


def init_params(key, num_daily_measurements=24, hidden_size=64,
                num_out_channels=1):
    """Synthetic params with the PyTorch Conv2d-equivalent shapes, stored in
    (out, in) matmul layout (weights) and (out, 1) column layout (biases)."""
    k1, k2, k3, k4, k5, k6 = jax.random.split(key, 6)
    D, H, C = num_daily_measurements, hidden_size, num_out_channels

    def uinit(k, shape, fan_in):
        bound = 1.0 / jnp.sqrt(fan_in)
        return jax.random.uniform(k, shape, jnp.float32, -bound, bound)

    return {
        # conv_1.weight (H,1,1,D) -> (H,D) ; conv_1.bias (H,) -> (H,1)
        "w1": uinit(k1, (H, D), D), "b1": uinit(k2, (H, 1), D),
        # conv_2.weight (H,1,1,H) -> (H,H)
        "w2": uinit(k3, (H, H), H), "b2": uinit(k4, (H, 1), H),
        # conv_3.weight (C,1,1,H) -> (C,H)
        "w3": uinit(k5, (C, H), H), "b3": uinit(k6, (C, 1), H),
    }


def degree_days_dnn(temperature, params, num_out_channels=1, tile_m=1024):
    """temperature: (B, S, D) float32.

    Returns (B, S) when num_out_channels == 1, else (B, C, S), matching the
    PyTorch module's output convention.
    """
    B, S, D = temperature.shape
    C = num_out_channels
    H = params["w1"].shape[0]
    M = B * S

    # Feature-major layout: (D, M) with M on the lane axis; bf16 halves the
    # dominant HBM read.
    x_t = temperature.reshape(M, D).T.astype(jnp.bfloat16)

    # Tile M in multiples of 128 lanes; pad so the grid divides evenly.
    tm = min(tile_m, _round_up(M, 128))
    m_pad = _round_up(M, tm)
    if m_pad != M:
        x_t = jnp.pad(x_t, ((0, 0), (0, m_pad - M)))

    w1 = params["w1"].astype(jnp.bfloat16)
    w2 = params["w2"].astype(jnp.bfloat16)
    w3 = params["w3"].astype(jnp.bfloat16)
    b1, b2, b3 = params["b1"], params["b2"], params["b3"]

    grid = (m_pad // tm,)
    resident = lambda i: (0, 0)        # constant block index -> stays in VMEM
    in_specs = [
        pl.BlockSpec((D, tm), lambda i: (0, i)),   # x tile (double-buffered DMA)
        pl.BlockSpec((H, D), resident),
        pl.BlockSpec((H, 1), resident),
        pl.BlockSpec((H, H), resident),
        pl.BlockSpec((H, 1), resident),
        pl.BlockSpec((C, H), resident),
        pl.BlockSpec((C, 1), resident),
    ]
    out_spec = pl.BlockSpec((C, tm), lambda i: (0, i))

    cost = pl.CostEstimate(
        flops=2 * m_pad * (D * H + H * H + H * C),
        transcendentals=m_pad * C,
        bytes_accessed=(m_pad * D * 2                       # x (bf16)
                        + (H * D + H * H + C * H) * 2       # weights (bf16)
                        + (2 * H + C) * 4                   # biases (f32)
                        + m_pad * C * 4),                   # output (f32)
    )

    out = pl.pallas_call(
        _degree_days_mlp_kernel,
        out_shape=jax.ShapeDtypeStruct((C, m_pad), jnp.float32),
        grid=grid,
        in_specs=in_specs,
        out_specs=out_spec,
        compiler_params=pltpu.CompilerParams(
            dimension_semantics=("parallel",)),
        cost_estimate=cost,
    )(x_t, w1, b1, w2, b2, w3, b3)

    out = out[:, :M].reshape(C, B, S)
    if C == 1:
        return out[0]                            # (B, S)
    return jnp.transpose(out, (1, 0, 2))         # (B, C, S)


def _reference(temperature, params, num_out_channels=1):
    """Pure-JAX reference of the same math (same bf16/f32 mixed precision)."""
    B, S, D = temperature.shape
    C = num_out_channels
    x = temperature.reshape(B * S, D).astype(jnp.bfloat16)
    w1 = params["w1"].astype(jnp.bfloat16)
    w2 = params["w2"].astype(jnp.bfloat16)
    w3 = params["w3"].astype(jnp.bfloat16)
    h1 = jnp.maximum(
        jnp.dot(x, w1.T, preferred_element_type=jnp.float32) + params["b1"].T,
        0.0).astype(jnp.bfloat16)
    h2 = jnp.maximum(
        jnp.dot(h1, w2.T, preferred_element_type=jnp.float32) + params["b2"].T,
        0.0).astype(jnp.bfloat16)
    z = jax.nn.sigmoid(
        jnp.dot(h2, w3.T, preferred_element_type=jnp.float32) + params["b3"].T)
    z = jnp.transpose(z.reshape(B, S, C), (0, 2, 1))
    return z[:, 0, :] if C == 1 else z


if __name__ == "__main__":
    # Shapes consistent with the module: batch=2, seq (days)=16,
    # num_daily_measurements=24, hidden_size=64, num_out_channels=1.
    B, S, D, H, C = 2, 16, 24, 64, 1
    key = jax.random.PRNGKey(0)
    k_param, k_data = jax.random.split(key)
    params = init_params(k_param, num_daily_measurements=D,
                         hidden_size=H, num_out_channels=C)
    temperature = jax.random.normal(k_data, (B, S, D), jnp.float32) * 10.0 + 15.0

    out = jax.block_until_ready(
        degree_days_dnn(temperature, params, num_out_channels=C))
    ref = _reference(temperature, params, num_out_channels=C)
    assert out.shape == (B, S), out.shape
    assert jnp.allclose(out, ref, atol=2e-3, rtol=2e-3), \
        float(jnp.max(jnp.abs(out - ref)))

    # Second check: exercises the multi-tile grid, M padding, and C > 1 path.
    B2, S2, C2 = 4, 400, 3
    params2 = init_params(jax.random.PRNGKey(1), num_daily_measurements=D,
                          hidden_size=H, num_out_channels=C2)
    temp2 = jax.random.normal(jax.random.PRNGKey(2), (B2, S2, D), jnp.float32)
    out2 = jax.block_until_ready(
        degree_days_dnn(temp2, params2, num_out_channels=C2))
    ref2 = _reference(temp2, params2, num_out_channels=C2)
    assert out2.shape == (B2, C2, S2), out2.shape
    assert jnp.allclose(out2, ref2, atol=2e-3, rtol=2e-3), \
        float(jnp.max(jnp.abs(out2 - ref2)))

    print("KERNEL_OK")
</pallas_src>

<mosaic_0001>
module attributes {stable_mosaic.version = 11 : i64} {
  func.func @_degree_days_mlp_kernel(%arg0: i32, %arg1: memref<24x128xbf16, #tpu.memory_space<vmem>>, %arg2: memref<64x24xbf16, #tpu.memory_space<vmem>>, %arg3: memref<64x1xf32, #tpu.memory_space<vmem>>, %arg4: memref<64x64xbf16, #tpu.memory_space<vmem>>, %arg5: memref<64x1xf32, #tpu.memory_space<vmem>>, %arg6: memref<1x64xbf16, #tpu.memory_space<vmem>>, %arg7: memref<1x1xf32, #tpu.memory_space<vmem>>, %arg8: memref<1x128xf32, #tpu.memory_space<vmem>>) attributes {dimension_semantics = [#tpu.dimension_semantics<parallel>], iteration_bounds = array<i64: 1>, scalar_prefetch = 0 : i64, scratch_operands = 0 : i64, tpu.core_type = #tpu.core_type<tc>, window_params = [{transform_indices = @transform_0, window_bounds = array<i64: 24, 128>}, {pipeline_mode = #tpu.pipeline_mode<synchronous>, transform_indices = @transform_1, window_bounds = array<i64: 64, 24>}, {pipeline_mode = #tpu.pipeline_mode<synchronous>, transform_indices = @transform_2, window_bounds = array<i64: 64, 1>}, {pipeline_mode = #tpu.pipeline_mode<synchronous>, transform_indices = @transform_3, window_bounds = array<i64: 64, 64>}, {pipeline_mode = #tpu.pipeline_mode<synchronous>, transform_indices = @transform_4, window_bounds = array<i64: 64, 1>}, {pipeline_mode = #tpu.pipeline_mode<synchronous>, transform_indices = @transform_5, window_bounds = array<i64: 1, 64>}, {pipeline_mode = #tpu.pipeline_mode<synchronous>, transform_indices = @transform_6, window_bounds = array<i64: 1, 1>}, {transform_indices = @transform_7, window_bounds = array<i64: 1, 128>}]} {
    %c0 = arith.constant 0 : index
    %c0_0 = arith.constant 0 : index
    %0 = vector.load %arg1[%c0, %c0_0] : memref<24x128xbf16, #tpu.memory_space<vmem>>, vector<24x128xbf16>
    %c0_1 = arith.constant 0 : index
    %c0_2 = arith.constant 0 : index
    %1 = vector.load %arg2[%c0_1, %c0_2] : memref<64x24xbf16, #tpu.memory_space<vmem>>, vector<64x24xbf16>
    %cst = arith.constant dense<0.000000e+00> : vector<64x128xf32>
    %2 = tpu.matmul %1, %0, %cst {dimension_numbers = #tpu.dot_dimension_numbers<[1], [0], [0], [1], [0, 0, 1, 1], [], []>} : vector<64x24xbf16>, vector<24x128xbf16>, vector<64x128xf32> -> vector<64x128xf32>
    %c0_3 = arith.constant 0 : index
    %c0_4 = arith.constant 0 : index
    %3 = vector.load %arg3[%c0_3, %c0_4] : memref<64x1xf32, #tpu.memory_space<vmem>>, vector<64x1xf32>
    %4 = vector.broadcast %3 : vector<64x1xf32> to vector<64x128xf32>
    %5 = arith.addf %2, %4 : vector<64x128xf32>
    %cst_5 = arith.constant 0.000000e+00 : f32
    %6 = vector.broadcast %cst_5 : f32 to vector<64x128xf32>
    %7 = arith.maximumf %5, %6 : vector<64x128xf32>
    %8 = arith.truncf %7 : vector<64x128xf32> to vector<64x128xbf16>
    %c0_6 = arith.constant 0 : index
    %c0_7 = arith.constant 0 : index
    %9 = vector.load %arg4[%c0_6, %c0_7] : memref<64x64xbf16, #tpu.memory_space<vmem>>, vector<64x64xbf16>
    %cst_8 = arith.constant dense<0.000000e+00> : vector<64x128xf32>
    %10 = tpu.matmul %9, %8, %cst_8 {dimension_numbers = #tpu.dot_dimension_numbers<[1], [0], [0], [1], [0, 0, 1, 1], [], []>} : vector<64x64xbf16>, vector<64x128xbf16>, vector<64x128xf32> -> vector<64x128xf32>
    %c0_9 = arith.constant 0 : index
    %c0_10 = arith.constant 0 : index
    %11 = vector.load %arg5[%c0_9, %c0_10] : memref<64x1xf32, #tpu.memory_space<vmem>>, vector<64x1xf32>
    %12 = vector.broadcast %11 : vector<64x1xf32> to vector<64x128xf32>
    %13 = arith.addf %10, %12 : vector<64x128xf32>
    %cst_11 = arith.constant 0.000000e+00 : f32
    %14 = vector.broadcast %cst_11 : f32 to vector<64x128xf32>
    %15 = arith.maximumf %13, %14 : vector<64x128xf32>
    %16 = arith.truncf %15 : vector<64x128xf32> to vector<64x128xbf16>
    %c0_12 = arith.constant 0 : index
    %c0_13 = arith.constant 0 : index
    %17 = vector.load %arg6[%c0_12, %c0_13] : memref<1x64xbf16, #tpu.memory_space<vmem>>, vector<1x64xbf16>
    %cst_14 = arith.constant dense<0.000000e+00> : vector<1x128xf32>
    %18 = tpu.matmul %17, %16, %cst_14 {dimension_numbers = #tpu.dot_dimension_numbers<[1], [0], [0], [1], [0, 0, 1, 1], [], []>} : vector<1x64xbf16>, vector<64x128xbf16>, vector<1x128xf32> -> vector<1x128xf32>
    %c0_15 = arith.constant 0 : index
    %c0_16 = arith.constant 0 : index
    %19 = vector.load %arg7[%c0_15, %c0_16] : memref<1x1xf32, #tpu.memory_space<vmem>>, vector<1x1xf32>
    %20 = vector.broadcast %19 : vector<1x1xf32> to vector<1x128xf32>
    %21 = arith.addf %18, %20 : vector<1x128xf32>
    %22 = arith.negf %21 : vector<1x128xf32>
    %23 = math.exp %22 : vector<1x128xf32>
    %cst_17 = arith.constant 1.000000e+00 : f32
    %24 = vector.broadcast %cst_17 : f32 to vector<1x128xf32>
    %25 = arith.addf %24, %23 : vector<1x128xf32>
    %26 = arith.divf %24, %25 : vector<1x128xf32>
    %c0_18 = arith.constant 0 : index
    %c0_19 = arith.constant 0 : index
    %27 = vector.load %arg8[%c0_18, %c0_19] : memref<1x128xf32, #tpu.memory_space<vmem>>, vector<1x128xf32>
    tpu.vector_store %arg8[%c0_18, %c0_19], %26 {strides = array<i32>} : memref<1x128xf32, #tpu.memory_space<vmem>>, vector<1x128xf32>,
    return
  }
  func.func @transform_0(%arg0: i32) -> (i32, i32) {
    %c0_i32 = arith.constant 0 : i32
    %c0_i32_0 = arith.constant 0 : i32
    return %c0_i32, %arg0 : i32, i32
  }
  func.func @transform_1(%arg0: i32) -> (i32, i32) {
    %c0_i32 = arith.constant 0 : i32
    %c0_i32_0 = arith.constant 0 : i32
    %c0_i32_1 = arith.constant 0 : i32
    return %c0_i32, %c0_i32_0 : i32, i32
  }
  func.func @transform_2(%arg0: i32) -> (i32, i32) {
    %c0_i32 = arith.constant 0 : i32
    %c0_i32_0 = arith.constant 0 : i32
    %c0_i32_1 = arith.constant 0 : i32
    return %c0_i32, %c0_i32_0 : i32, i32
  }
  func.func @transform_3(%arg0: i32) -> (i32, i32) {
    %c0_i32 = arith.constant 0 : i32
    %c0_i32_0 = arith.constant 0 : i32
    %c0_i32_1 = arith.constant 0 : i32
    return %c0_i32, %c0_i32_0 : i32, i32
  }
  func.func @transform_4(%arg0: i32) -> (i32, i32) {
    %c0_i32 = arith.constant 0 : i32
    %c0_i32_0 = arith.constant 0 : i32
    %c0_i32_1 = arith.constant 0 : i32
    return %c0_i32, %c0_i32_0 : i32, i32
  }
  func.func @transform_5(%arg0: i32) -> (i32, i32) {
    %c0_i32 = arith.constant 0 : i32
    %c0_i32_0 = arith.constant 0 : i32
    %c0_i32_1 = arith.constant 0 : i32
    return %c0_i32, %c0_i32_0 : i32, i32
  }
  func.func @transform_6(%arg0: i32) -> (i32, i32) {
    %c0_i32 = arith.constant 0 : i32
    %c0_i32_0 = arith.constant 0 : i32
    %c0_i32_1 = arith.constant 0 : i32
    return %c0_i32, %c0_i32_0 : i32, i32
  }
  func.func @transform_7(%arg0: i32) -> (i32, i32) {
    %c0_i32 = arith.constant 0 : i32
    %c0_i32_0 = arith.constant 0 : i32
    return %c0_i32, %arg0 : i32, i32
  }
}

</mosaic_0001>

<bundles_post_ra>
// kernel: tpu_custom_call.1
= control target key start
LH: loop header
LB: loop body
LE: loop exit
PB: predicated region body
PF: predicated region fallthrough
CT: control target
= control target key end

     0   :  { %s715_s0 = inlined_call_operand.vmem [shape: bf16[24,128], index: 0, kind: input, shape index: {}]   ;;  %s716_s1 = inlined_call_operand.vmem [shape: bf16[64,24], index: 1, kind: input, shape index: {}]   ;;  %s717_s2 = inlined_call_operand.vmem [shape: f32[64,1], index: 2, kind: input, shape index: {}]   ;;  %s718_s3 = inlined_call_operand.vmem [shape: bf16[64,64], index: 3, kind: input, shape index: {}]   ;;  %s719_s4 = inlined_call_operand.vmem [shape: f32[64,1], index: 4, kind: input, shape index: {}]   ;;  %s720_s5 = inlined_call_operand.vmem [shape: bf16[1,64], index: 5, kind: input, shape index: {}]   ;;  %s721_s6 = inlined_call_operand.<no memory space> [shape: f32[1,1], index: 6, kind: input, shape index: {}]   ;;  %s722_s7 = inlined_call_operand.hbm [shape: f32[1,128], index: 7, kind: output, shape index: {}]  }
   0x1   :  { %v12_v0 = vstv %s721_s6 }
   0x2   :  { %13 = vst [vmem:[#allocation2] sm:$0x1] %v12_v0 }
   0x3   :  { %v539_v1 = vld [vmem:[%s715_s0 + $0x8] ss:$0 sps:$4 sm:$0xff]   ;;  %vm131_vm0 = vcmask 1043456   ;;  %v540_v2 = vld [vmem:[%s715_s0] sm:$0xff]   ;;  %vm118_vm1 = vcmask 195584   ;;  %v575_v5 = vmov 0  }
   0x4   :  { %532 = vmatprep.subr.msk.bf16.mxu0 %vm131_vm0, %v539_v1  ;;  %v133_v3 = vsel %vm131_vm0, %v539_v1, 0  ;;  %v541_v4 = vld [vmem:[%s716_s1] sm:$0xff]   ;;  %537 = vset.pattern.permute.xlu0 %v575_v5  ;;  %v47_v6 = vld [vmem:[%s717_s2 + $0x30] sm:$0xff]  ;;  %v542_v7 = vld [vmem:[%s716_s1 + $0x8] sm:$0xff]  }
   0x5   :  { %493 = vmatpush3.bf16.msra.mxu0 %v133_v3  ;;  %496 = vmatprep.mubr.msk.bf16.mxu0 %vm118_vm1, %v541_v4  ;;  %v45_v8 = vld [vmem:[%s717_s2 + $0x20] sm:$0xff]  ;;  %v543_v9 = vld [vmem:[%s716_s1 + $0x10] sm:$0xff]   ;;  %v48_v10 = vld [vmem:[%s717_s2 + $0x38] sm:$0xff] }
   0x6   :  { %494 = vmatprep.subr.bf16.mxu0 %v540_v2  ;;  %538 = vset.pattern.permute.xlu1 %v575_v5  ;;  %v46_v11 = vld [vmem:[%s717_s2 + $0x28] sm:$0xff]  ;;  %v43_v12 = vld [vmem:[%s717_s2 + $0x10] sm:$0xff]  ;;  %v44_v13 = vld [vmem:[%s717_s2 + $0x18] sm:$0xff] }
   0x7   :  { %81 = vperm.xlu0 %537, %v47_v6   ;;  %71 = vperm.xlu1 %538, %v45_v8   ;;  %v544_v14 = vld [vmem:[%s716_s1 + $0x18] sm:$0xff]  }
   0x9   :  { %495 = vmatpush3.bf16.msra.mxu0 %v540_v2 }
   0xb   :  { %86 = vperm.xlu0 %537, %v48_v10   ;;  %76 = vperm.xlu1 %538, %v46_v11  }
   0xc   :  { %497 = vmatmul.mubr.msk.bf16.vlgmr.msra.gmra.mxu0 %vm118_vm1, %v542_v7 }
   0xd   :  { %500 = vmatprep.mubr.msk.bf16.mxu0 %vm118_vm1, %v543_v9 }
   0xf   :  { %61 = vperm.xlu0 %537, %v43_v12  }
  0x10   :  { %14 = vsyncpa [#allocation4], 0  ;;  %v41_v15 = vld [vmem:[%s717_s2] sm:$0xff]  ;;  %66 = vperm.xlu1 %538, %v44_v13   ;;  %v42_v16 = vld [vmem:[%s717_s2 + $0x8] sm:$0xff]  ;;  %vm288_vm2 = vcmask 523264   ;;  %v576_v2 = vmov 0.0  }
  0x11   :  { %v226_v17 = vld [vmem:[%s719_s4 + $0x30] sm:$0xff]  ;;  %v227_v18 = vld [vmem:[%s719_s4 + $0x38] sm:$0xff]  ;;  %v224_v19 = vld [vmem:[%s719_s4 + $0x20] sm:$0xff]  ;;  %520 = vmatprep.subr.bf16.mxu0 %v576_v2  ;;  %vm577_vm3 = vmmov 0   ;;  %s578_s26 = smov [#allocation3]  }
  0x12   :  { %v225_v20 = vld [vmem:[%s719_s4 + $0x28] sm:$0xff]  ;;  %v222_v21 = vld [vmem:[%s719_s4 + $0x10] sm:$0xff]  ;;  %v223_v22 = vld [vmem:[%s719_s4 + $0x18] sm:$0xff]  ;;  %s445_s27 = sshll.u32 %s578_s26, 4  ;;  %s446_s27 = int_to_ptr.vmem [resolvable:$true] %s445_s27 }
  0x13   :  { %51 = vperm.xlu0 %537, %v41_v15   ;;  %v220_v23 = vld [vmem:[%s719_s4] sm:$0xff]  ;;  %v221_v24 = vld [vmem:[%s719_s4 + $0x8] sm:$0xff]  ;;  %v547_v0 = vld [vmem:[%s718_s3 + $0x10] sm:$0xff]   ;;  %s557_s28 = scalar_lea.vmem %s446_s27, 32  ;;  %p558_p1 = scmp.lt.s32.totalorder %s446_s27, %s446_s27 }
  0x14   :  { %501 = vmatmul.mubr.msk.bf16.gmra.mxu0 %vm118_vm1, %v544_v14  ;;  %56 = vperm.xlu1 %538, %v42_v16   ;;  %v379_v25 = vld [vmem:[#allocation2] sm:$0x1]  ;;  %v546_v63 = vld [vmem:[%s718_s3 + $0x8] sm:$0xff]   ;;  %v548_v1 = vld [vmem:[%s718_s3 + $0x18] sm:$0xff]  }
  0x15   :  { %v545_v26 = vld [vmem:[%s718_s3] sm:$0xff]   ;;  %528 = vmatprep.mubr.msk.bf16.mxu0 %vm577_vm3, %v576_v2 }
  0x16   :  { %512 = vmatprep.mubr.msk.bf16.mxu1 %vm288_vm2, %v545_v26 }
  0x17   :  { %260 = vperm.xlu0 %537, %v226_v17  }
  0x18   :  { %265 = vperm.xlu1 %538, %v227_v18  }
  0x1b   :  { %250 = vperm.xlu0 %537, %v224_v19  }
  0x1c   :  { %255 = vperm.xlu1 %538, %v225_v20  }
  0x1f   :  { %240 = vperm.xlu0 %537, %v222_v21  }
  0x20   :  { %245 = vperm.xlu1 %538, %v223_v22  }
  0x23   :  { %230 = vperm.xlu0 %537, %v220_v23  }
  0x24   :  { %235 = vperm.xlu1 %538, %v221_v24  }
  0x27   :  { %382 = vperm.xlu0 %537, %v379_v25  }
  0x82   :  { %v72_v27 = vpop.permute.xlu1 %71  ;;  %v82_v29 = vpop.permute.xlu0 %81 }
  0x86   :  { %v77_v32 = vpop.permute.xlu1 %76  ;;  %v87_v34 = vpop.permute.xlu0 %86 }
  0x8a   :  { %v62_v42 = vpop.permute.xlu0 %61 }
  0x8b   :  { %v67_v38 = vpop.permute.xlu1 %66 }
  0x8e   :  { %v52_v56 = vpop.permute.xlu0 %51 }
  0x8f   :  { %v57_v52 = vpop.permute.xlu1 %56 }
  0x92   :  { %v261_v6 = vpop.permute.xlu0 %260 }
  0x93   :  { %v266_v4 = vpop.permute.xlu1 %265 }
  0x96   :  { %v251_v11 = vpop.permute.xlu0 %250 }
  0x97   :  { %v256_v9 = vpop.permute.xlu1 %255 }
  0x9a   :  { %v241_v22 = vpop.permute.xlu0 %240 }
  0x9b   :  { %v246_v16 = vpop.permute.xlu1 %245 }
  0xcc   :  { %v498_v28 = vpop.f32.mrf.mxu0 }
  0xcd   :  { %v178_v48 = vadd.f32 %v498_v28, %v62_v42  ;;  %v236_v28 = vpop.permute.xlu1 %235 }
  0xce   :  { %v169_v30 = vpop.f32.mrf.mxu0 }
  0xcf   :  { %v202_v57 = vmax.f32 %v178_v48, 0.0  ;;  %v170_v58 = vadd.f32 %v169_v30, %v52_v56 }
  0xd0   :  { %v499_v31 = vpop.f32.mrf.mxu0 }
  0xd1   :  { %v181_v44 = vadd.f32 %v499_v31, %v67_v38  ;;  %v200_v61 = vmax.f32 %v170_v58, 0.0 }
  0xd2   :  { %v172_v33 = vpop.f32.mrf.mxu0 }
  0xd3   :  { %v203_v53 = vmax.f32 %v181_v44, 0.0  ;;  %v173_v54 = vadd.f32 %v172_v33, %v57_v52 }
  0xd4   :  { %v502_v35 = vpop.f32.mrf.mxu0 }
  0xd5   :  { %v194_v37 = vadd.f32 %v502_v35, %v82_v29  ;;  %v209_v59 = vpack.c.bf16 %v203_v53, %v202_v57  ;;  %v201_v60 = vmax.f32 %v173_v54, 0.0 }
  0xd6   :  { %v185_v36 = vpop.f32.mrf.mxu0 }
  0xd7   :  { %v186_v40 = vadd.f32 %v185_v36, %v72_v27  ;;  %v206_v45 = vmax.f32 %v194_v37, 0.0  ;;  %v208_v62 = vpack.c.bf16 %v201_v60, %v200_v61 }
  0xd8   :  { %v503_v39 = vpop.f32.mrf.mxu0 }
  0xd9   :  { %v197_v41 = vadd.f32 %v503_v39, %v87_v34  ;;  %v204_v49 = vmax.f32 %v186_v40, 0.0  ;;  %v378_v39 = vld [vmem:[%s720_s5] sm:$0x1]  ;;  %v385_v40 = vlaneseq  ;;  %s553_s5 = scalar_lea.vmem %s446_s27, 16 }
  0xda   :  { %v188_v43 = vpop.f32.mrf.mxu0  ;;  %p554_p0 = scmp.ne.s32.totalorder %s446_s27, %s553_s5  ;;  %p559_p2 = scmp.lt.s32.totalorder %s557_s28, %s553_s5 }
  0xdb   :  { %v207_v46 = vmax.f32 %v197_v41, 0.0  ;;  %v189_v47 = vadd.f32 %v188_v43, %v77_v32  ;;  %v231_v32 = vpop.permute.xlu0 %230  ;;  %v386_v41 = vshrl.u32 %v385_v40, 7 }
  0xdc   :  { %p560_p3 = por %p559_p2, %p558_p1 }
  0xdd   :  { %v205_v50 = vmax.f32 %v189_v47, 0.0  ;;  %v211_v51 = vpack.c.bf16 %v207_v46, %v206_v45  ;;  %v387_v42 = vsub.s32 0, %v386_v41 }
  0xde   :  { %p561_p4 = pnand %p560_p3, %p554_p0 }
  0xdf   :  { %v210_v55 = vpack.c.bf16 %v205_v50, %v204_v49  ;;  %504 = vmatprep.subr.bf16.mxu1 %v211_v51  ;;  %v383_v43 = vpop.permute.xlu0 %382 }
  0xe0   :  { %505 = vmatpush3.bf16.msra.mxu1 %v211_v51  ;;  %v388_v44 = vrot.slane %v383_v43, %v387_v42 }
  0xe1   :  { %506 = vmatprep.subr.bf16.mxu1 %v210_v55 }
  0xe4   :  { %507 = vmatpush3.bf16.msra.mxu1 %v210_v55 }
  0xe5   :  { %508 = vmatprep.subr.bf16.mxu1 %v209_v59 }
  0xe8   :  { %509 = vmatpush3.bf16.msra.mxu1 %v209_v59 }
  0xe9   :  { %510 = vmatprep.subr.bf16.mxu1 %v208_v62 }
  0xec   :  { %511 = vmatpush3.bf16.msra.mxu1 %v208_v62 }
  0xef   :  { %513 = vmatmul.mubr.msk.bf16.vlgmr.msra.gmra.mxu1 %vm288_vm2, %v546_v63 }
  0xf0   :  { %516 = vmatprep.mubr.msk.bf16.mxu1 %vm288_vm2, %v547_v0 }
  0xf7   :  { %517 = vmatmul.mubr.msk.bf16.gmra.mxu1 %vm288_vm2, %v548_v1 }
 0x1af   :  { %v514_v3 = vpop.f32.mrf.mxu1 }
 0x1b0   :  { %v344_v26 = vadd.f32 %v514_v3, %v241_v22 }
 0x1b1   :  { %v335_v5 = vpop.f32.mrf.mxu1 }
 0x1b2   :  { %v368_v33 = vmax.f32 %v344_v26, 0.0  ;;  %v336_v34 = vadd.f32 %v335_v5, %v231_v32 }
 0x1b3   :  { %v515_v7 = vpop.f32.mrf.mxu1 }
 0x1b4   :  { %v347_v23 = vadd.f32 %v515_v7, %v246_v16  ;;  %v366_v37 = vmax.f32 %v336_v34, 0.0 }
 0x1b5   :  { %v338_v8 = vpop.f32.mrf.mxu1 }
 0x1b6   :  { %v369_v29 = vmax.f32 %v347_v23, 0.0  ;;  %v339_v30 = vadd.f32 %v338_v8, %v236_v28 }
 0x1b7   :  { %v518_v10 = vpop.f32.mrf.mxu1 }
 0x1b8   :  { %v360_v13 = vadd.f32 %v518_v10, %v261_v6  ;;  %v375_v35 = vpack.c.bf16 %v369_v29, %v368_v33  ;;  %v367_v36 = vmax.f32 %v339_v30, 0.0 }
 0x1b9   :  { %v351_v12 = vpop.f32.mrf.mxu1 }
 0x1ba   :  { %v372_v18 = vmax.f32 %v360_v13, 0.0  ;;  %v352_v19 = vadd.f32 %v351_v12, %v251_v11  ;;  %v374_v38 = vpack.c.bf16 %v367_v36, %v366_v37 }
 0x1bb   :  { %v519_v14 = vpop.f32.mrf.mxu1 }
 0x1bc   :  { %v363_v15 = vadd.f32 %v519_v14, %v266_v4  ;;  %v370_v27 = vmax.f32 %v352_v19, 0.0 }
 0x1bd   :  { %v354_v17 = vpop.f32.mrf.mxu1 }
 0x1be   :  { %v373_v20 = vmax.f32 %v363_v15, 0.0  ;;  %v355_v21 = vadd.f32 %v354_v17, %v256_v9 }
 0x1c0   :  { %v377_v24 = vpack.c.bf16 %v373_v20, %v372_v18  ;;  %v371_v25 = vmax.f32 %v355_v21, 0.0 }
 0x1c2   :  { %521 = vmatpush3.bf16.msra.mxu0 %v377_v24  ;;  %v376_v31 = vpack.c.bf16 %v371_v25, %v370_v27 }
 0x1c3   :  { %522 = vmatprep.subr.bf16.mxu0 %v576_v2 }
 0x1c6   :  { %523 = vmatpush3.bf16.msra.mxu0 %v376_v31 }
 0x1c7   :  { %524 = vmatprep.subr.bf16.mxu0 %v576_v2 }
 0x1ca   :  { %525 = vmatpush3.bf16.msra.mxu0 %v375_v35 }
 0x1cb   :  { %526 = vmatprep.subr.bf16.mxu0 %v576_v2 }
 0x1ce   :  { %527 = vmatpush3.bf16.msra.mxu0 %v374_v38 }
 0x1d1   :  { %529 = vmatmul.mubr.msk.bf16.vlgmr.msra.gmra.mxu0 %vm288_vm2, %v378_v39 }
 0x291   :  { %v426_v45 = vpop.f32.mrf.mxu0 }
 0x292   :  { %v427_v46 = vadd.f32 %v426_v45, %v388_v44 }
 0x293   :  { %v530_v47 = vpop.f32.mrf.mxu0 }
 0x294   :  { %v472_v48 = vmul.f32 -1.442695, %v427_v46 }
 0x295   :  { %v429_v49 = vpop.f32.mrf.mxu0 }
 0x296   :  { %549 = vpow2.f32 %v472_v48 }
 0x297   :  { %v531_v50 = vpop.f32.mrf.mxu0 }
 0x2a3   :  { %v550_v51 = vpop.eup %549 }
 0x2a4   :  { %v435_v52 = vadd.f32 1.0, %v550_v51 }
 0x2a6   :  { %551 = vrcp.f32 %v435_v52 }
 0x2b3   :  { %v552_v53 = vpop.eup %551 }
 0x2b4   :  { %438 = vst [vmem:[#allocation3] sm:$0x1] %v552_v53 }
 0x2b5   :  { %564 = shalt.err (!%p561_p4)
}
 0x2b6   :  { %448 = dma.vmem_to_hbm [thread:$0]  %s446_s27, 16, %s722_s7, [#allocation4]  }
 0x2b7   :  { %573 = dma.done.wait [#allocation4], 16  }
 0x2b8   :  { %574 = vsyncadd [#allocation4], 4294967280 }
 0x2b9   :  { %452 = vsyncpa [#allocation4], 1 }

</bundles_post_ra>
